<compile_context>
chip_gen: v7x
topology: tpu7x:2x2x1
jax: 0.10.0
libtpu: 0.0.40
codegen_flags: <defaults>
</compile_context>

<pallas_src>
import jax
import jax.numpy as jnp
from jax.experimental import pallas as pl
from jax.experimental.pallas import tpu as pltpu


# -----------------------------------------------------------------------------
# Pallas kernel: whole SE forward for one image per grid step.
#   x_ref  : (1, C, H*W)   channels on sublanes, spatial on lanes
#   w1_ref : (mid, C)      fc1 weight with BN folded in
#   b1_ref : (mid, 1)      fc1 bias with BN folded in
#   w2_ref : (C, mid)      fc2 weight
#   b2_ref : (C, 1)        fc2 bias
#   out_ref: (1, C, H*W)
# -----------------------------------------------------------------------------
def _se_kernel(x_ref, w1_ref, b1_ref, w2_ref, b2_ref, out_ref):
    x = x_ref[0]                                                # (C, HW) f32

    # ---- global average pool over the spatial (lane) axis -------------------
    pooled = jnp.mean(x, axis=1, keepdims=True)                 # (C, 1)

    # ---- fc1 (1x1 conv, BN folded) + ReLU ------------------------------------
    y1 = jnp.dot(w1_ref[...], pooled,
                 preferred_element_type=jnp.float32) + b1_ref[...]   # (mid, 1)
    y1 = jnp.maximum(y1, 0.0)

    # ---- fc2 (1x1 conv) + sigmoid -------------------------------------------
    z = jnp.dot(w2_ref[...], y1,
                preferred_element_type=jnp.float32) + b2_ref[...]    # (C, 1)
    y = 1.0 / (1.0 + jnp.exp(-z))                               # sigmoid

    # ---- channel-wise scale; single full-width (lane-dense) store ------------
    out_ref[0] = x * y


# -----------------------------------------------------------------------------
# Wrapper
# -----------------------------------------------------------------------------
def se_pallas(x_nchw, folded_params):
    w1, b1, w2, b2 = folded_params
    N, C, H, W = x_nchw.shape
    HW = H * W
    x2d = x_nchw.reshape(N, C, HW)      # merge trailing dims (layout-preserving)

    full = lambda a: pl.BlockSpec(a.shape, lambda n: (0, 0))
    out = pl.pallas_call(
        _se_kernel,
        out_shape=jax.ShapeDtypeStruct((N, C, HW), jnp.float32),
        grid_spec=pltpu.PrefetchScalarGridSpec(
            num_scalar_prefetch=0,
            grid=(N,),
            in_specs=[
                pl.BlockSpec((1, C, HW), lambda n: (n, 0, 0)),
                full(w1), full(b1), full(w2), full(b2),
            ],
            out_specs=pl.BlockSpec((1, C, HW), lambda n: (n, 0, 0)),
        ),
        compiler_params=pltpu.CompilerParams(
            dimension_semantics=("parallel",)),
    )(x2d, w1, b1, w2, b2)
    return out.reshape(N, C, H, W)


# -----------------------------------------------------------------------------
# Deterministic synthetic parameters in PyTorch layout + host-side BN folding
# -----------------------------------------------------------------------------
def make_raw_params(key, channels, se_ratio=12):
    C = channels
    mid = C // se_ratio
    assert mid >= 1, "channels must be >= se_ratio"
    ks = jax.random.split(key, 8)
    nrm = lambda k, shape: 0.1 * jax.random.normal(k, shape, jnp.float32)
    return dict(
        w1=nrm(ks[0], (mid, C, 1, 1)),                       # Conv2d(C, mid, 1)
        b1=nrm(ks[1], (mid,)),
        gamma=1.0 + 0.1 * jax.random.normal(ks[2], (mid,), jnp.float32),
        beta=0.1 * jax.random.normal(ks[3], (mid,), jnp.float32),
        mean=0.1 * jax.random.normal(ks[4], (mid,), jnp.float32),
        var=0.5 + 0.2 * jnp.abs(jax.random.normal(ks[5], (mid,), jnp.float32)),
        w2=nrm(ks[6], (C, mid, 1, 1)),                       # Conv2d(mid, C, 1)
        b2=nrm(ks[7], (C,)),
        eps=1e-5,
    )


def fold_params(p):
    """Fold eval-mode BatchNorm into the first 1x1 conv; repack for the kernel."""
    s = p["gamma"] / jnp.sqrt(p["var"] + p["eps"])            # (mid,)
    w1f = p["w1"][:, :, 0, 0] * s[:, None]                    # (mid, C)
    b1f = ((p["b1"] - p["mean"]) * s + p["beta"])[:, None]    # (mid, 1)
    w2f = p["w2"][:, :, 0, 0]                                 # (C, mid)
    b2f = p["b2"][:, None]                                    # (C, 1)
    return w1f, b1f, w2f, b2f


# -----------------------------------------------------------------------------
# Pure-JAX reference: un-folded, eval-mode PyTorch math
# -----------------------------------------------------------------------------
def ref_forward(x_nchw, p):
    hp = jax.lax.Precision.HIGHEST
    pooled = x_nchw.mean(axis=(2, 3))                                    # (N, C)
    y = jnp.einsum('nc,mc->nm', pooled, p["w1"][:, :, 0, 0],
                   precision=hp) + p["b1"]
    y = (y - p["mean"]) / jnp.sqrt(p["var"] + p["eps"]) * p["gamma"] + p["beta"]
    y = jnp.maximum(y, 0.0)
    y = jnp.einsum('nm,cm->nc', y, p["w2"][:, :, 0, 0],
                   precision=hp) + p["b2"]
    y = jax.nn.sigmoid(y)
    return x_nchw * y[:, :, None, None]


if __name__ == "__main__":
    # SE(in_channels=24, channels=24, se_ratio=12)  ->  mid = 2
    # (channels must be >= se_ratio for channels // se_ratio >= 1)
    N, C, H, W = 2, 24, 16, 16

    key = jax.random.PRNGKey(0)
    kx, kp = jax.random.split(key)
    x = jax.random.normal(kx, (N, C, H, W), jnp.float32)      # PyTorch NCHW

    raw = make_raw_params(kp, C, se_ratio=12)
    folded = fold_params(raw)

    out = se_pallas(x, folded)
    out = jax.block_until_ready(out)

    ref = ref_forward(x, raw)
    assert out.shape == (N, C, H, W)
    err = float(jnp.max(jnp.abs(out - ref)))
    assert err < 1e-4, f"max abs err {err}"
    print("KERNEL_OK")
</pallas_src>

<mosaic_0001>
module attributes {stable_mosaic.version = 11 : i64} {
  func.func @_se_kernel(%arg0: i32, %arg1: memref<1x24x256xf32, #tpu.memory_space<vmem>>, %arg2: memref<2x24xf32, #tpu.memory_space<vmem>>, %arg3: memref<2x1xf32, #tpu.memory_space<vmem>>, %arg4: memref<24x2xf32, #tpu.memory_space<vmem>>, %arg5: memref<24x1xf32, #tpu.memory_space<vmem>>, %arg6: memref<1x24x256xf32, #tpu.memory_space<vmem>>) attributes {dimension_semantics = [#tpu.dimension_semantics<parallel>], iteration_bounds = array<i64: 2>, scalar_prefetch = 0 : i64, scratch_operands = 0 : i64, tpu.core_type = #tpu.core_type<tc>, window_params = [{transform_indices = @transform_0, window_bounds = array<i64: 1, 24, 256>}, {pipeline_mode = #tpu.pipeline_mode<synchronous>, transform_indices = @transform_1, window_bounds = array<i64: 2, 24>}, {pipeline_mode = #tpu.pipeline_mode<synchronous>, transform_indices = @transform_2, window_bounds = array<i64: 2, 1>}, {pipeline_mode = #tpu.pipeline_mode<synchronous>, transform_indices = @transform_3, window_bounds = array<i64: 24, 2>}, {pipeline_mode = #tpu.pipeline_mode<synchronous>, transform_indices = @transform_4, window_bounds = array<i64: 24, 1>}, {transform_indices = @transform_5, window_bounds = array<i64: 1, 24, 256>}]} {
    %c0 = arith.constant 0 : index
    %c0_0 = arith.constant 0 : index
    %c0_1 = arith.constant 0 : index
    %0 = vector.load %arg1[%c0, %c0_0, %c0_1] : memref<1x24x256xf32, #tpu.memory_space<vmem>>, vector<1x24x256xf32>
    %1 = vector.shape_cast %0 : vector<1x24x256xf32> to vector<24x256xf32>
    %cst = arith.constant dense<0.000000e+00> : vector<24xf32>
    %2 = vector.multi_reduction <add>, %1, %cst [1] : vector<24x256xf32> to vector<24xf32>
    %3 = vector.shape_cast %2 : vector<24xf32> to vector<24x1xf32>
    %cst_2 = arith.constant 2.560000e+02 : f32
    %4 = vector.broadcast %cst_2 : f32 to vector<24x1xf32>
    %5 = arith.divf %3, %4 : vector<24x1xf32>
    %c0_3 = arith.constant 0 : index
    %c0_4 = arith.constant 0 : index
    %6 = vector.load %arg2[%c0_3, %c0_4] : memref<2x24xf32, #tpu.memory_space<vmem>>, vector<2x24xf32>
    %cst_5 = arith.constant dense<0.000000e+00> : vector<2x1xf32>
    %7 = tpu.matmul %6, %5, %cst_5 {dimension_numbers = #tpu.dot_dimension_numbers<[1], [0], [0], [1], [0, 0, 1, 1], [], []>} : vector<2x24xf32>, vector<24x1xf32>, vector<2x1xf32> -> vector<2x1xf32>
    %c0_6 = arith.constant 0 : index
    %c0_7 = arith.constant 0 : index
    %8 = vector.load %arg3[%c0_6, %c0_7] : memref<2x1xf32, #tpu.memory_space<vmem>>, vector<2x1xf32>
    %9 = arith.addf %7, %8 : vector<2x1xf32>
    %cst_8 = arith.constant 0.000000e+00 : f32
    %10 = vector.broadcast %cst_8 : f32 to vector<2x1xf32>
    %11 = arith.maximumf %9, %10 : vector<2x1xf32>
    %c0_9 = arith.constant 0 : index
    %c0_10 = arith.constant 0 : index
    %12 = vector.load %arg4[%c0_9, %c0_10] : memref<24x2xf32, #tpu.memory_space<vmem>>, vector<24x2xf32>
    %cst_11 = arith.constant dense<0.000000e+00> : vector<24x1xf32>
    %13 = tpu.matmul %12, %11, %cst_11 {dimension_numbers = #tpu.dot_dimension_numbers<[1], [0], [0], [1], [0, 0, 1, 1], [], []>} : vector<24x2xf32>, vector<2x1xf32>, vector<24x1xf32> -> vector<24x1xf32>
    %c0_12 = arith.constant 0 : index
    %c0_13 = arith.constant 0 : index
    %14 = vector.load %arg5[%c0_12, %c0_13] : memref<24x1xf32, #tpu.memory_space<vmem>>, vector<24x1xf32>
    %15 = arith.addf %13, %14 : vector<24x1xf32>
    %cst_14 = arith.constant 0.000000e+00 : f32
    %16 = vector.broadcast %cst_14 : f32 to vector<24x1xf32>
    %17 = arith.subf %16, %15 : vector<24x1xf32>
    %18 = math.exp %17 : vector<24x1xf32>
    %cst_15 = arith.constant 1.000000e+00 : f32
    %19 = vector.broadcast %cst_15 : f32 to vector<24x1xf32>
    %20 = arith.addf %19, %18 : vector<24x1xf32>
    %cst_16 = arith.constant 1.000000e+00 : f32
    %21 = vector.broadcast %cst_16 : f32 to vector<24x1xf32>
    %22 = arith.divf %21, %20 : vector<24x1xf32>
    %23 = vector.broadcast %22 : vector<24x1xf32> to vector<24x256xf32>
    %24 = arith.mulf %1, %23 : vector<24x256xf32>
    %c0_17 = arith.constant 0 : index
    %c0_18 = arith.constant 0 : index
    %c0_19 = arith.constant 0 : index
    %25 = vector.load %arg6[%c0_17, %c0_18, %c0_19] : memref<1x24x256xf32, #tpu.memory_space<vmem>>, vector<1x24x256xf32>
    %26 = vector.shape_cast %25 : vector<1x24x256xf32> to vector<24x256xf32>
    %27 = vector.shape_cast %24 : vector<24x256xf32> to vector<1x24x256xf32>
    tpu.vector_store %arg6[%c0_17, %c0_18, %c0_19], %27 {strides = array<i32>} : memref<1x24x256xf32, #tpu.memory_space<vmem>>, vector<1x24x256xf32>,
    return
  }
  func.func @transform_0(%arg0: i32) -> (i32, i32, i32) {
    %c0_i32 = arith.constant 0 : i32
    %c0_i32_0 = arith.constant 0 : i32
    %c0_i32_1 = arith.constant 0 : i32
    return %arg0, %c0_i32, %c0_i32_0 : i32, i32, i32
  }
  func.func @transform_1(%arg0: i32) -> (i32, i32) {
    %c0_i32 = arith.constant 0 : i32
    %c0_i32_0 = arith.constant 0 : i32
    %c0_i32_1 = arith.constant 0 : i32
    return %c0_i32, %c0_i32_0 : i32, i32
  }
  func.func @transform_2(%arg0: i32) -> (i32, i32) {
    %c0_i32 = arith.constant 0 : i32
    %c0_i32_0 = arith.constant 0 : i32
    %c0_i32_1 = arith.constant 0 : i32
    return %c0_i32, %c0_i32_0 : i32, i32
  }
  func.func @transform_3(%arg0: i32) -> (i32, i32) {
    %c0_i32 = arith.constant 0 : i32
    %c0_i32_0 = arith.constant 0 : i32
    %c0_i32_1 = arith.constant 0 : i32
    return %c0_i32, %c0_i32_0 : i32, i32
  }
  func.func @transform_4(%arg0: i32) -> (i32, i32) {
    %c0_i32 = arith.constant 0 : i32
    %c0_i32_0 = arith.constant 0 : i32
    %c0_i32_1 = arith.constant 0 : i32
    return %c0_i32, %c0_i32_0 : i32, i32
  }
  func.func @transform_5(%arg0: i32) -> (i32, i32, i32) {
    %c0_i32 = arith.constant 0 : i32
    %c0_i32_0 = arith.constant 0 : i32
    %c0_i32_1 = arith.constant 0 : i32
    return %arg0, %c0_i32, %c0_i32_0 : i32, i32, i32
  }
}

</mosaic_0001>

<bundles_post_ra>
// kernel: tpu_custom_call.1
= control target key start
LH: loop header
LB: loop body
LE: loop exit
PB: predicated region body
PF: predicated region fallthrough
CT: control target
= control target key end

     0   :  { %10 = vsyncpa [#allocation3], 0  ;;  %s1037_s0 = inlined_call_operand.hbm [shape: f32[2,24,256], index: 0, kind: input, shape index: {}]   ;;  %s1038_s1 = inlined_call_operand.vmem [shape: f32[2,24], index: 1, kind: input, shape index: {}]   ;;  %s1039_s2 = inlined_call_operand.vmem [shape: f32[2,1], index: 2, kind: input, shape index: {}]   ;;  %s1040_s3 = inlined_call_operand.vmem [shape: f32[24,2], index: 3, kind: input, shape index: {}]   ;;  %s1041_s4 = inlined_call_operand.vmem [shape: f32[24,1], index: 4, kind: input, shape index: {}]   ;;  %s1042_s5 = inlined_call_operand.hbm [shape: f32[2,24,256], index: 5, kind: output, shape index: {}]  }
   0x1   :  { %12 = vsyncpa [#allocation3 + $0x1], 0 }
   0x2   :  { %13 = vsyncpa [#allocation4], 0 }
   0x3   :  { %15 = vsyncpa [#allocation4 + $0x1], 0  ;;  %s825_s18 = smov 0   ;;  %s827_s19 = smov 0  }
   0x4   :  { %s829_s20 = smov 0   ;;  %s831_s21 = smov 0  }
   0x5 LB: > { %s846_s22 = sadd.s32 4294967295, %s783_s21   ;;  %s571_s23 = sadd.s32 4294967294, %s783_s21   ;;  %s783_s21 = sphi %s831_s21, %s1054_s21   ;;  %s779_s20 = sphi %s829_s20, %s1053_s20   ;;  %s775_s19 = sphi %s827_s19, %s1052_s19   ;;  %s771_s18 = sphi %s825_s18, %s1051_s18  }
   0x6   : > { %s850_s24 = sadd.s32 1, %s783_s21   ;;  %s28_s25 = sadd.s32 1, %s779_s20 }
   0x7   : > { %s25_s26 = ssub.s32 %s783_s21, %s850_s24  ;;  %p35_p0 = scmp.ne.s32.totalorder %s779_s20, %s775_s19 }
   0x8   : > { %p26_p1 = scmp.eq.s32.totalorder %s25_s26, 0  ;;  %p36_p2 = scmp.eq.s32.totalorder %s783_s21, 0 }
   0x9   : > { %p41_p3 = scmp.ne.s32.totalorder %s775_s19, %s771_s18  ;;  %p42_p4 = scmp.eq.s32.totalorder %s846_s22, 0 }
   0xa   : > { %s862_s27 = scalar_select %p26_p1, %s779_s20, %s28_s25  }
   0xb   : > { %p37_p5 = por %p36_p2, %p35_p0  ;;  %p864_p6 = por %p42_p4, %p41_p3 }
   0xc   : > { %p149_p7 = scmp.eq.s32.totalorder %s846_s22, 1  ;;  %p155_p8 = scmp.eq.s32.totalorder %s571_s23, 1 }
   0xd   : > { %p631_p10 = scmp.lt.s32.totalorder %s783_s21, 2  ;;  %s187_s6 = sand.u32 1, %s779_s20  }
   0xe   : > { %p871_p11 = por %p149_p7, %p35_p0  ;;  %p875_p12 = por %p155_p8, %p41_p3 }
   0xf   : > { %s616_s7 = smul.u32 768, %s783_s21  ;;  %p886_p13 = pnand %p631_p10, %p37_p5 }
  0x10   : > { %s1045_s29 = scalar_select %p871_p11, 1, 0 }
  0x11   : > { %s1046_s30 = scalar_select %p875_p12, 1, 0 }
  0x12   : > { %s615_s8 = smul.u32 48, %s187_s6  ;;  %s884_s11 = scalar_lea.hbm %s1037_s0, %s616_s7 }
  0x13   : > { %s892_s15 = scalar_lea.sflag [#allocation3], %s187_s6  ;;  %s687_s16 = scalar_lea.hbm %s884_s11, 768 }
  0x14   : > { %s191_s13 = scalar_lea.vmem [#allocation2], %s615_s8  ;;  %p688_p0 = scmp.ne.s32.totalorder %s884_s11, %s687_s16 }
  0x15   : > { %s198_s14 = sshll.u32 %s191_s13, 4  ;;  %p689_p1 = pneg %p886_p13  ;;  %s890_s14 = int_to_ptr.vmem [resolvable:$true] %s198_s14 }
  0x16   : > { %s692_s25 = scalar_lea.hbm %s1037_s0, 1536  ;;  %p693_p4 = scmp.lt.u32.totalorder %s884_s11, %s1037_s0 }
  0x17   : > { %p690_p2 = pnand %p689_p1, %p688_p0  ;;  %p694_p5 = scmp.lt.u32.totalorder %s692_s25, %s687_s16 }
  0x18   : > { %p696_p8 = scmp.lt.u32.totalorder %s687_s16, %s884_s11 }
  0x19   : > { %p691_p3 = pneg %p690_p2  ;;  %p695_p7 = por %p694_p5, %p693_p4 }
  0x1b   : > { %p697_p10 = por %p696_p8, %p695_p7 }
  0x1d   : > { %p698_p9 = pnand %p697_p10, %p691_p3 }
  0x1f   : > { %701 = shalt.err (!%p698_p9)
}
  0x20   : > { %s702_s6 = scalar_lea.vmem %s890_s14, 768  ;;  %s785_s8 = smov [#allocation2]  }
  0x21   : > { %p703_p0 = scmp.ne.s32.totalorder %s890_s14, %s702_s6  ;;  %s707_s9 = sshll.u32 %s785_s8, 4  ;;  %s708_s9 = int_to_ptr.vmem [resolvable:$false] %s707_s9 }
  0x22   : > { %s709_s10 = scalar_lea.vmem %s708_s9, 1536  ;;  %p710_p11 = scmp.lt.s32.totalorder %s890_s14, %s708_s9 }
  0x23   : > { %p705_p2 = pnand %p703_p0, %p689_p1  ;;  %p711_p4 = scmp.lt.s32.totalorder %s709_s10, %s702_s6 }
  0x25   : > { %p706_p12 = pneg %p705_p2  ;;  %p712_p5 = por %p711_p4, %p710_p11 }
  0x27   : > { %p713_p7 = pnand %p712_p5, %p706_p12 }
  0x29   : > { %716 = shalt.err (!%p713_p7)
}
  0x2a   : > { %s786_s13 = smov 256   ;;  %s787_s16 = smov 16  }
  0x2b   : > { %626 = dma.hbm_to_vmem [thread:$0]  (!%p886_p13), %s884_s11, 768, %s890_s14, %s892_s15, %s786_s13, %s786_s13, %s787_s16  }
  0x2c   : > { %p575_p9 = scmp.ge.s32.totalorder %s783_s21, 1  ;;  %p206_p1 = scmp.lt.s32.totalorder %s783_s21, 3 }
  0x2e   : > { %p207_p3 = pnand %p575_p9, %p206_p1 }
  0x2f   : > { %s923_s17 = sand.u32 (!%p207_p3), 1, %s775_s19  }
  0x30   : > { %210 = sbr.rel (%p207_p3) target bundleno = 826 (0x33a), region = 40  ;;  %s213_s25 = scalar_lea.sflag (!%p207_p3), [#allocation3], %s923_s17 }
  0x31   : > { %s617_s23 = smul.u32 (!%p207_p3), 48, %s923_s17 }
  0x33   : > { %s216_s26 = scalar_lea.vmem (!%p207_p3), [#allocation2], %s617_s23 }
  0x37   : > { %762 = dma.done.wait (%p864_p6), %s213_s25, 768  }
  0x38   : > { %764 = vsyncadd (%p864_p6), %s213_s25, 4294966528  ;;  %v933_v0 = vld [vmem:[%s216_s26] sm:$0xff]  ;;  %v935_v1 = vld [vmem:[%s216_s26 + $0x8] sm:$0xff]  ;;  %v788_v9 = vmov 0.0|0.0   ;;  %v789_v10 = vmov 0.0   ;;  %vm790_vm0 = vmmov 0  }
  0x39   : > { %v937_v2 = vld [vmem:[%s216_s26 + $0x10] sm:$0xff]  ;;  %v249_v3 = vadd.f32 %v935_v1, %v933_v0  ;;  %v941_v4 = vld [vmem:[%s216_s26 + $0x18] sm:$0xff]  ;;  %v943_v5 = vld [vmem:[%s216_s26 + $0x20] sm:$0xff]  ;;  %612 = vmatprep.subr.bf16.mxu0 %v788_v9  ;;  %601 = vmatprep.subr.mxu1 %v789_v10  ;;  %vm264_vm1 = vcmask 195584   ;;  %vm355_vm2 = vcmask 1041408   ;;  %vm345_vm3 = vcmask 15360  }
  0x3a   : > { %v945_v6 = vld [vmem:[%s216_s26 + $0x28] sm:$0xff]  ;;  %v252_v8 = vadd.f32 %v941_v4, %v937_v2  ;;  %598 = vmatprep.mubr.msk.f32.mxu0 %vm790_vm0, %v789_v10  ;;  %603 = vmatprep.mubr.msk.f32.mxu1 %vm790_vm0, %v789_v10  ;;  %v262_v18 = vld [vmem:[%s1038_s1] sm:$0x3]  ;;  %v341_v26 = vld [vmem:[%s1040_s3 + $0x10] sm:$0xff]  ;;  %v791_v27 = vmov 0   ;;  %s242_s12 = scalar_lea.vmem [#allocation5], %s617_s23 }
  0x3b   : > { %v255_v7 = vadd.f32 %v945_v6, %v943_v5  ;;  %250 = vadd.xlane.f32.xlu0 %v249_v3  ;;  %v263_v19 = vld [vmem:[%s1039_s2] sm:$0x3]  ;;  %v340_v25 = vld [vmem:[%s1040_s3 + $0x8] sm:$0xff]  ;;  %673 = vset.pattern.permute.xlu1 %v791_v27  ;;  %v344_v38 = vld [vmem:[%s1041_s4 + $0x10] sm:$0xff]  ;;  %s498_s14 = sshll.u32 %s242_s12, 4  ;;  %s618_s15 = smul.u32 768, %s846_s22  ;;  %s986_s14 = int_to_ptr.vmem [resolvable:$true] %s498_s14 }
  0x3c   : > { %v339_v24 = vld [vmem:[%s1040_s3] sm:$0xff]  ;;  %674 = vset.pattern.permute.xlu0 %v791_v27  ;;  %v343_v32 = vld [vmem:[%s1041_s4 + $0x8] sm:$0xff]  ;;  %s485_s22 = scalar_lea.sflag [#allocation4], %s923_s17  ;;  %s717_s8 = scalar_lea.vmem %s986_s14, 768 }
  0x3d   : > { %256 = vadd.xlane.f32.xlu1 %v255_v7  ;;  %v342_v28 = vld [vmem:[%s1041_s4] sm:$0xff]  ;;  %s991_s6 = scalar_lea.hbm %s1042_s5, %s618_s15  ;;  %p718_p6 = scmp.ne.s32.totalorder %s986_s14, %s717_s8 }
  0x3e   : > { %p1048_p11 = scmp.ne.s32.totalorder %s1045_s29, 0  ;;  %s792_s9 = smov [#allocation5]  }
  0x3f   : > { %253 = vadd.xlane.f32.xlu0 %v252_v8  ;;  %s721_s10 = sshll.u32 %s792_s9, 4  ;;  %s722_s10 = int_to_ptr.vmem [resolvable:$false] %s721_s10 }
  0x40   : > { %p719_p12 = pnand %p718_p6, %p1048_p11  ;;  %s723_s13 = scalar_lea.vmem %s722_s10, 1536 }
  0x41   : > { %p724_p8 = scmp.lt.s32.totalorder %s986_s14, %s722_s10  ;;  %p725_p10 = scmp.lt.s32.totalorder %s723_s13, %s717_s8 }
  0x42   : > { %p720_p13 = pneg %p719_p12 }
  0x43   : > { %p726_p0 = por %p725_p10, %p724_p8 }
  0x45   : > { %p727_p2 = pnand %p726_p0, %p720_p13 }
  0xc8   : > { %v251_v11 = vpop.xlane.xlu0 %250 }
  0xc9   : > { %v259_v13 = vmul.f32 0.00390625, %v251_v11 }
  0xca   : > { %v257_v15 = vpop.xlane.xlu1 %256 }
  0xcb   : > { %v261_v17 = vmul.f32 0.00390625, %v257_v15 }
  0xcc   : > { %v254_v12 = vpop.xlane.xlu0 %253 }
  0xcd   : > { %v260_v14 = vmul.f32 0.00390625, %v254_v12 }
  0xcf   : > { %v613_v16 = vpack.c.bf16 %v260_v14, %v259_v13 }
  0xd1   : > { %614 = vmatpush3.bf16.msra.mxu0 %v613_v16 }
  0xd2   : > { %596 = vmatprep.subr.mxu0 %v789_v10 }
  0xd5   : > { %597 = vmatpush3.msra.mxu0 %v261_v17 }
  0xd6   : > { %599 = vmatmul.mubr.msk.f32.vlgmr.msra.gmra.mrb[0].mxu0 %vm264_vm1, %v262_v18 }
 0x1a9   : > { %v334_v20 = vpop.f32.mrb[0].mxu0 }
 0x1aa   : > { %v335_v21 = vadd.f32 %v334_v20, %v263_v19  ;;  %v600_v22 = vpop.f32.mrb[1].mxu0 }
 0x1ac   : > { %v338_v23 = vmax.f32 %v335_v21, 0.0 }
 0x1ae   : > { %602 = vmatpush3.msk.msra.mxu1 %vm355_vm2, %v338_v23 }
 0x1af   : > { %604 = vmatmul.mubr.msk.f32.vlgmr.msra.gmra.mrb[0].mxu1 %vm345_vm3, %v339_v24 }
 0x1b0   : > { %606 = vmatprep.mubr.msk.f32.mxu1 %vm790_vm0, %v789_v10 }
 0x1b3   : > { %607 = vmatmul.mubr.msk.f32.gmra.mrb[2].mxu1 %vm345_vm3, %v340_v25 }
 0x1b4   : > { %609 = vmatprep.mubr.msk.f32.mxu1 %vm790_vm0, %v789_v10 }
 0x1b7   : > { %610 = vmatmul.mubr.msk.f32.gmra.mrb[4].mxu1 %vm345_vm3, %v341_v26 }
 0x282   : > { %v425_v29 = vpop.f32.mrb[0].mxu1 }
 0x283   : > { %v426_v30 = vadd.f32 %v425_v29, %v342_v28  ;;  %v605_v31 = vpop.f32.mrb[1].mxu1 }
 0x285   : > { %v439_v33 = vsub.f32 0.0, %v426_v30 }
 0x286   : > { %v430_v34 = vpop.f32.mrb[2].mxu1 }
 0x287   : > { %v442_v35 = vmul.f32 1.442695, %v439_v33  ;;  %v431_v36 = vadd.f32 %v430_v34, %v343_v32  ;;  %v608_v37 = vpop.f32.mrb[3].mxu1 }
 0x289   : > { %675 = vpow2.f32 %v442_v35  ;;  %v440_v39 = vsub.f32 0.0, %v431_v36 }
 0x28a   : > { %v435_v40 = vpop.f32.mrb[4].mxu1 }
 0x28b   : > { %v444_v41 = vmul.f32 1.442695, %v440_v39  ;;  %v436_v42 = vadd.f32 %v435_v40, %v344_v38  ;;  %v611_v43 = vpop.f32.mrb[5].mxu1 }
 0x28d   : > { %677 = vpow2.f32 %v444_v41  ;;  %v441_v44 = vsub.f32 0.0, %v436_v42 }
 0x28f   : > { %v446_v45 = vmul.f32 1.442695, %v441_v44 }
 0x291   : > { %679 = vpow2.f32 %v446_v45 }
 0x293   : > { %v676_v46 = vpop.eup %675 }
 0x294   : > { %v448_v47 = vadd.f32 1.0, %v676_v46 }
 0x296   : > { %681 = vrcp.f32 %v448_v47 }
 0x297   : > { %v678_v48 = vpop.eup %677 }
 0x298   : > { %v449_v49 = vadd.f32 1.0, %v678_v48 }
 0x29a   : > { %683 = vrcp.f32 %v449_v49 }
 0x29b   : > { %v680_v50 = vpop.eup %679 }
 0x29c   : > { %v450_v51 = vadd.f32 1.0, %v680_v50 }
 0x29e   : > { %685 = vrcp.f32 %v450_v51 }
 0x2a0   : > { %v682_v52 = vpop.eup %681 }
 0x2a1   : > { %459 = vperm.xlu1 %673, %v682_v52  }
 0x2a4   : > { %v684_v53 = vpop.eup %683 }
 0x2a5   : > { %464 = vperm.xlu0 %674, %v684_v53  }
 0x2a8   : > { %v686_v54 = vpop.eup %685 }
 0x2a9   : > { %469 = vperm.xlu1 %673, %v686_v54  }
 0x320   : > { %v460_v55 = vpop.permute.xlu1 %459 }
 0x321   : > { %v472_v56 = vmul.f32 %v460_v55, %v933_v0  ;;  %v473_v57 = vmul.f32 %v460_v55, %v935_v1 }
 0x323   : > { %478 = vst [vmem:[%s242_s12] sm:$0xff] %v472_v56  ;;  %479 = vst [vmem:[%s242_s12 + $0x8] sm:$0xff] %v473_v57 }
 0x324   : > { %v465_v58 = vpop.permute.xlu0 %464 }
 0x325   : > { %v474_v59 = vmul.f32 %v465_v58, %v937_v2  ;;  %v475_v60 = vmul.f32 %v465_v58, %v941_v4 }
 0x327   : > { %480 = vst [vmem:[%s242_s12 + $0x10] sm:$0xff] %v474_v59  ;;  %481 = vst [vmem:[%s242_s12 + $0x18] sm:$0xff] %v475_v60 }
 0x328   : > { %v470_v61 = vpop.permute.xlu1 %469 }
 0x329   : > { %v476_v62 = vmul.f32 %v470_v61, %v943_v5  ;;  %v477_v63 = vmul.f32 %v470_v61, %v945_v6 }
 0x32b   : > { %482 = vst [vmem:[%s242_s12 + $0x20] sm:$0xff] %v476_v62  ;;  %483 = vst [vmem:[%s242_s12 + $0x28] sm:$0xff] %v477_v63 }
 0x32c   : > { %730 = shalt.err (!%p727_p2)
}
 0x32d   : > { %s731_s16 = scalar_lea.hbm %s991_s6, 768  ;;  %s735_s28 = scalar_lea.hbm %s1042_s5, 1536 }
 0x32e   : > { %p732_p4 = scmp.ne.s32.totalorder %s991_s6, %s731_s16  ;;  %p736_p9 = scmp.lt.u32.totalorder %s991_s6, %s1042_s5 }
 0x32f   : > { %p737_p1 = scmp.lt.u32.totalorder %s735_s28, %s731_s16  ;;  %p739_p6 = scmp.lt.u32.totalorder %s731_s16, %s991_s6 }
 0x330   : > { %p733_p5 = pnand %p732_p4, %p1048_p11 }
 0x331   : > { %p738_p3 = por %p737_p1, %p736_p9 }
 0x332   : > { %p734_p7 = pneg %p733_p5 }
 0x333   : > { %p740_p12 = por %p739_p6, %p738_p3 }
 0x335   : > { %p741_p13 = pnand %p740_p12, %p734_p7 }
 0x337   : > { %744 = shalt.err (!%p741_p13)
}
 0x338   : > { %s793_s15 = smov 256   ;;  %s794_s23 = smov 16  }
 0x339   : > { %621 = dma.vmem_to_hbm [thread:$0]  (%p1048_p11), %s986_s14, 768, %s991_s6, %s485_s22, %s793_s15, %s793_s15, %s794_s23  }
 0x33a PF: > { %s513_s7 = sand.u32 1, %s771_s18   ;;  %p1049_p8 = scmp.ne.s32.totalorder %s1046_s30, 0 }
 0x33b   : > { %p1050_p10 = scmp.ge.s32.totalorder %s783_s21, 2  ;;  %s514_s8 = scalar_lea.sflag [#allocation4], %s513_s7 }
 0x33d   : > { %p628_p0 = pnand %p1050_p10, %p1049_p8 }
 0x33f   : > { %766 = dma.done.wait (!%p628_p0), %s514_s8, 768  }
 0x340   : > { %768 = vsyncadd (!%p628_p0), %s514_s8, 4294966528  ;;  %p18_p2 = scmp.ge.s32.totalorder %s850_s24, 4   ;;  %s1051_s18 = smov %s775_s19 }
 0x341   : > { %s1052_s19 = smov %s779_s20  ;;  %s1053_s20 = smov %s862_s27 }
 0x342   : > { %s1054_s21 = smov %s850_s24  ;;  %20 = sbr.rel (!%p18_p2) target bundleno = 5 (0x5), region = 85 }
 0x349   :  { %519 = vsyncpa [#allocation3], 1 }
 0x34a   :  { %521 = vsyncpa [#allocation3 + $0x1], 1 }
 0x34b   :  { %522 = vsyncpa [#allocation4], 1 }
 0x34c   :  { %524 = vsyncpa [#allocation4 + $0x1], 1 }

</bundles_post_ra>
